<compile_context>
chip_gen: v6e
topology: v6e:2x2x1
jax: 0.10.0
libtpu: 0.0.40
codegen_flags: <defaults>
</compile_context>

<pallas_src>
import math
from functools import partial

import numpy as np
import jax
import jax.numpy as jnp
from jax.experimental import pallas as pl
from jax.experimental.pallas import tpu as pltpu

# Small shapes consistent with the module structure (d_model % num_heads == 0).
D_MODEL = 32
NUM_HEADS = 4
D_K = D_MODEL // NUM_HEADS
D_FF = 64
BATCH = 2
SEQ = 8
EPS = 1e-5  # nn.LayerNorm default


def _layernorm(y, gamma, beta):
    mean = jnp.mean(y, axis=-1, keepdims=True)
    var = jnp.mean((y - mean) ** 2, axis=-1, keepdims=True)
    return (y - mean) * jax.lax.rsqrt(var + EPS) * gamma + beta


def encoder_layer_kernel(xbb_ref, w_ref, pm_ref, out_ref, *, d_model, num_heads):
    D = d_model
    H = num_heads

    xbb = xbb_ref[...]                        # (N, D + H*N) f32
    x = xbb[:, :D]                            # (N, D) tokens
    smask = xbb[:, D:]                        # (N, H*N) additive batch mask (0 / -1e9)

    w = w_ref[...].astype(jnp.bfloat16)       # (D, 3D), cast once for the MXU
    w_qk = w[:, :2 * D]                       # (D, 2D) fused [Wq*scale | Wk]
    w_o = w[:, 2 * D:]                        # (D, D)

    pm = pm_ref[...]                          # (8 + H*N, D) f32
    bq = pm[0:1, :]                           # already scaled by 1/sqrt(d_k)
    bk = pm[1:2, :]
    bo = pm[2:3, :]
    g1 = pm[3:4, :]
    be1 = pm[4:5, :]
    g2 = pm[5:6, :]
    be2 = pm[6:7, :]
    mv = pm[8:, :].astype(jnp.bfloat16)       # (H*N, D) 0/1 block-diag head mask

    # Fused Q/K projection: one lane-dense (N,D)@(D,2D) matmul.
    xb = x.astype(jnp.bfloat16)
    qk = jnp.dot(xb, w_qk, preferred_element_type=jnp.float32)   # (N, 2D)
    q = qk[:, :D] + bq                        # scaled Q (scale folded in wrapper)
    k = qk[:, D:] + bk                        # K (== V, reference quirk)

    # Block-diagonal "big V": row r = (head h = r//N, key kk = r%N), only the
    # d_k columns belonging to head h are non-zero.  Shared by scores (as its
    # transpose), the context matmul and the softmax denominators.
    kb = k.astype(jnp.bfloat16)
    v_big = jnp.concatenate([kb] * H, axis=0) * mv               # (H*N, D)

    # Lane-packed scores: (N, H*N) slab, one matmul for all heads.
    s = jnp.einsum('nd,kd->nk', q.astype(jnp.bfloat16), v_big,
                   preferred_element_type=jnp.float32)           # (N, H*N)
    s = s + smask                             # cross-batch entries -> -1e9
    m = jnp.max(s, axis=-1, keepdims=True)    # per-row constant (valid for every head segment)
    p = jnp.exp(s - m)                        # masked entries underflow to exactly 0
    pb = p.astype(jnp.bfloat16)

    # Context + per-head softmax denominators, both as MXU matmuls.
    ctx = jnp.dot(pb, v_big, preferred_element_type=jnp.float32)       # (N, D), combine_heads layout
    denom = jnp.dot(pb, mv, preferred_element_type=jnp.float32)        # (N, D), per-head row sums
    ctx = ctx * pl.reciprocal(denom, approx=True)

    # combine_heads + W_o in one matmul: head reduction accumulates in the MXU.
    attn = jnp.dot(ctx.astype(jnp.bfloat16), w_o,
                   preferred_element_type=jnp.float32) + bo            # (N, D)

    # dropout == identity (eval semantics)
    x1 = _layernorm(x + attn, g1, be1)
    # feed_forward(x1) is dead code in the reference forward -> not computed.
    out_ref[...] = _layernorm(x1 + attn, g2, be2)


def encoder_layer_forward(x, mask, params):
    """params = (wq, bq, wk, bk, wo, bo, w1, b1, w2, b2, g1, be1, g2, be2).
    Linear weights are (in, out); biases / LN params are (1, dim). `mask` is
    accepted but never applied (reference semantics when a mask is provided).
    FFN params are accepted for interface fidelity but unused (dead code)."""
    del mask
    wq, bq, wk, bk, wo, bo, w1, b1, w2, b2, g1, be1, g2, be2 = params
    del w1, b1, w2, b2
    B, S, D = x.shape
    N = B * S
    H = NUM_HEADS
    dk = D // H
    scale = 1.0 / math.sqrt(dk)

    x2d = x.reshape(N, D)

    # Constant masks built once at trace time (no in-kernel iota/divides).
    # Score-slab column c <-> (head h = c // N, key token kk = c % N).
    q_b = np.arange(N) // S
    k_b = (np.arange(H * N) % N) // S
    smask = np.where(q_b[:, None] == k_b[None, :], 0.0, -1e9).astype(np.float32)
    # Block-diag head mask: MV[r, c] = (r // N == c // dk).
    mv = (np.arange(H * N)[:, None] // N == np.arange(D)[None, :] // dk)
    mv = mv.astype(np.float32)

    # Slab 1: tokens + additive batch score mask.
    x_bb = jnp.concatenate([x2d, jnp.asarray(smask)], axis=1)            # (N, D + H*N)
    # Slab 2: fused weights [Wq/sqrt(dk) | Wk | Wo].
    w_all = jnp.concatenate([wq * scale, wk, wo], axis=1)                # (D, 3D)
    # Slab 3: biases / LN params (8 aligned rows) + head mask MV.
    prm = jnp.concatenate([bq * scale, bk, bo, g1, be1, g2, be2,
                           jnp.zeros((1, D), jnp.float32)], axis=0)      # (8, D)
    pm_all = jnp.concatenate([prm, jnp.asarray(mv)], axis=0)             # (8 + H*N, D)

    vmem = pl.BlockSpec(memory_space=pltpu.MemorySpace.VMEM)
    out2d = pl.pallas_call(
        partial(encoder_layer_kernel, d_model=D, num_heads=H),
        out_shape=jax.ShapeDtypeStruct((N, D), jnp.float32),
        in_specs=[vmem, vmem, vmem],
        out_specs=vmem,
    )(x_bb, w_all, pm_all)
    return out2d.reshape(B, S, D)


def reference(x, params):
    """Pure-JAX f32 reference with identical semantics (for validation)."""
    wq, bq, wk, bk, wo, bo, w1, b1, w2, b2, g1, be1, g2, be2 = params
    B, S, D = x.shape
    q = x @ wq + bq
    k = x @ wk + bk
    v = k

    def split(t):
        return t.reshape(B, S, NUM_HEADS, D_K).transpose(0, 2, 1, 3)

    qh, kh, vh = split(q), split(k), split(v)
    s = jnp.einsum('bhqd,bhkd->bhqk', qh, kh) / math.sqrt(D_K)
    p = jax.nn.softmax(s, axis=-1)
    ctx = jnp.einsum('bhqk,bhkd->bhqd', p, vh)
    ctx = ctx.transpose(0, 2, 1, 3).reshape(B, S, D)
    attn = ctx @ wo + bo

    x1 = _layernorm(x + attn, g1, be1)
    return _layernorm(x1 + attn, g2, be2)


def make_params(key):
    ks = jax.random.split(key, 16)

    def lin(kw, kb, fan_in, fan_out):
        w = jax.random.normal(kw, (fan_in, fan_out), jnp.float32) * 0.05
        b = jax.random.normal(kb, (1, fan_out), jnp.float32) * 0.01
        return w, b

    wq, bq = lin(ks[0], ks[1], D_MODEL, D_MODEL)
    wk, bk = lin(ks[2], ks[3], D_MODEL, D_MODEL)
    wo, bo = lin(ks[4], ks[5], D_MODEL, D_MODEL)
    w1, b1 = lin(ks[6], ks[7], D_MODEL, D_FF)
    w2, b2 = lin(ks[8], ks[9], D_FF, D_MODEL)
    g1 = 1.0 + 0.1 * jax.random.normal(ks[10], (1, D_MODEL), jnp.float32)
    be1 = 0.1 * jax.random.normal(ks[11], (1, D_MODEL), jnp.float32)
    g2 = 1.0 + 0.1 * jax.random.normal(ks[12], (1, D_MODEL), jnp.float32)
    be2 = 0.1 * jax.random.normal(ks[13], (1, D_MODEL), jnp.float32)
    return (wq, bq, wk, bk, wo, bo, w1, b1, w2, b2, g1, be1, g2, be2)


if __name__ == "__main__":
    key = jax.random.PRNGKey(0)
    kx, kp = jax.random.split(key)
    x = jax.random.normal(kx, (BATCH, SEQ, D_MODEL), jnp.float32)
    mask = jnp.ones((BATCH, 1, SEQ, SEQ), jnp.float32)  # accepted, never applied
    params = make_params(kp)

    out = encoder_layer_forward(x, mask, params)
    out = jax.block_until_ready(out)

    ref_out = reference(x, params)
    assert out.shape == (BATCH, SEQ, D_MODEL)
    # Tolerance accounts for bf16 MXU inputs + approx reciprocal (f32 reference).
    assert jnp.allclose(out, ref_out, atol=2e-2, rtol=2e-2), "encoder output mismatch"
    print("KERNEL_OK")
</pallas_src>

<mosaic_0001>
module attributes {stable_mosaic.version = 11 : i64} {
  func.func @encoder_layer_kernel(%arg0: memref<16x96xf32, #tpu.memory_space<vmem>>, %arg1: memref<32x96xf32, #tpu.memory_space<vmem>>, %arg2: memref<72x32xf32, #tpu.memory_space<vmem>>, %arg3: memref<16x32xf32, #tpu.memory_space<vmem>>) attributes {dimension_semantics = [], scalar_prefetch = 0 : i64, scratch_operands = 0 : i64, tpu.core_type = #tpu.core_type<tc>} {
    %c0 = arith.constant 0 : index
    %c0_0 = arith.constant 0 : index
    %0 = vector.load %arg0[%c0, %c0_0] : memref<16x96xf32, #tpu.memory_space<vmem>>, vector<16x96xf32>
    %1 = vector.extract_strided_slice %0 {offsets = [0, 0], sizes = [16, 32], strides = [1, 1]} : vector<16x96xf32> to vector<16x32xf32>
    %2 = vector.extract_strided_slice %0 {offsets = [0, 32], sizes = [16, 64], strides = [1, 1]} : vector<16x96xf32> to vector<16x64xf32>
    %c0_1 = arith.constant 0 : index
    %c0_2 = arith.constant 0 : index
    %3 = vector.load %arg1[%c0_1, %c0_2] : memref<32x96xf32, #tpu.memory_space<vmem>>, vector<32x96xf32>
    %4 = arith.truncf %3 : vector<32x96xf32> to vector<32x96xbf16>
    %5 = vector.extract_strided_slice %4 {offsets = [0, 0], sizes = [32, 64], strides = [1, 1]} : vector<32x96xbf16> to vector<32x64xbf16>
    %6 = vector.extract_strided_slice %4 {offsets = [0, 64], sizes = [32, 32], strides = [1, 1]} : vector<32x96xbf16> to vector<32x32xbf16>
    %c0_3 = arith.constant 0 : index
    %c0_4 = arith.constant 0 : index
    %7 = vector.load %arg2[%c0_3, %c0_4] : memref<72x32xf32, #tpu.memory_space<vmem>>, vector<72x32xf32>
    %8 = vector.extract_strided_slice %7 {offsets = [0, 0], sizes = [1, 32], strides = [1, 1]} : vector<72x32xf32> to vector<1x32xf32>
    %9 = vector.extract_strided_slice %7 {offsets = [1, 0], sizes = [1, 32], strides = [1, 1]} : vector<72x32xf32> to vector<1x32xf32>
    %10 = vector.extract_strided_slice %7 {offsets = [2, 0], sizes = [1, 32], strides = [1, 1]} : vector<72x32xf32> to vector<1x32xf32>
    %11 = vector.extract_strided_slice %7 {offsets = [3, 0], sizes = [1, 32], strides = [1, 1]} : vector<72x32xf32> to vector<1x32xf32>
    %12 = vector.extract_strided_slice %7 {offsets = [4, 0], sizes = [1, 32], strides = [1, 1]} : vector<72x32xf32> to vector<1x32xf32>
    %13 = vector.extract_strided_slice %7 {offsets = [5, 0], sizes = [1, 32], strides = [1, 1]} : vector<72x32xf32> to vector<1x32xf32>
    %14 = vector.extract_strided_slice %7 {offsets = [6, 0], sizes = [1, 32], strides = [1, 1]} : vector<72x32xf32> to vector<1x32xf32>
    %15 = vector.extract_strided_slice %7 {offsets = [8, 0], sizes = [64, 32], strides = [1, 1]} : vector<72x32xf32> to vector<64x32xf32>
    %16 = arith.truncf %15 : vector<64x32xf32> to vector<64x32xbf16>
    %17 = arith.truncf %1 : vector<16x32xf32> to vector<16x32xbf16>
    %cst = arith.constant dense<0.000000e+00> : vector<16x64xf32>
    %18 = tpu.matmul %17, %5, %cst {dimension_numbers = #tpu.dot_dimension_numbers<[1], [0], [0], [1], [0, 0, 1, 1], [], []>} : vector<16x32xbf16>, vector<32x64xbf16>, vector<16x64xf32> -> vector<16x64xf32>
    %19 = vector.extract_strided_slice %18 {offsets = [0, 0], sizes = [16, 32], strides = [1, 1]} : vector<16x64xf32> to vector<16x32xf32>
    %20 = vector.broadcast %8 : vector<1x32xf32> to vector<16x32xf32>
    %21 = arith.addf %19, %20 : vector<16x32xf32>
    %22 = vector.extract_strided_slice %18 {offsets = [0, 32], sizes = [16, 32], strides = [1, 1]} : vector<16x64xf32> to vector<16x32xf32>
    %23 = vector.broadcast %9 : vector<1x32xf32> to vector<16x32xf32>
    %24 = arith.addf %22, %23 : vector<16x32xf32>
    %25 = arith.truncf %24 : vector<16x32xf32> to vector<16x32xbf16>
    %26 = tpu.concatenate %25, %25, %25, %25 in 0 : vector<16x32xbf16>, vector<16x32xbf16>, vector<16x32xbf16>, vector<16x32xbf16> -> vector<64x32xbf16>
    %27 = arith.mulf %26, %16 : vector<64x32xbf16>
    %28 = arith.truncf %21 : vector<16x32xf32> to vector<16x32xbf16>
    "tpu.trace_start"() <{level = 10 : i32, message = "nd,kd->nk"}> : () -> ()
    %cst_5 = arith.constant dense<0.000000e+00> : vector<16x64xf32>
    %29 = tpu.matmul %28, %27, %cst_5 {dimension_numbers = #tpu.dot_dimension_numbers<[1], [1], [0], [0], [0, 0, 1, 0], [], []>} : vector<16x32xbf16>, vector<64x32xbf16>, vector<16x64xf32> -> vector<16x64xf32>
    "tpu.trace_stop"() : () -> ()
    %30 = arith.addf %29, %2 : vector<16x64xf32>
    %cst_6 = arith.constant dense<0xFF800000> : vector<16xf32>
    %31 = vector.multi_reduction <maximumf>, %30, %cst_6 [1] : vector<16x64xf32> to vector<16xf32>
    %32 = vector.shape_cast %31 : vector<16xf32> to vector<16x1xf32>
    %33 = vector.broadcast %32 : vector<16x1xf32> to vector<16x64xf32>
    %34 = arith.subf %30, %33 : vector<16x64xf32>
    %35 = math.exp %34 : vector<16x64xf32>
    %36 = arith.truncf %35 : vector<16x64xf32> to vector<16x64xbf16>
    %cst_7 = arith.constant dense<0.000000e+00> : vector<16x32xf32>
    %37 = tpu.matmul %36, %27, %cst_7 {dimension_numbers = #tpu.dot_dimension_numbers<[1], [0], [0], [1], [0, 0, 1, 1], [], []>} : vector<16x64xbf16>, vector<64x32xbf16>, vector<16x32xf32> -> vector<16x32xf32>
    %cst_8 = arith.constant dense<0.000000e+00> : vector<16x32xf32>
    %38 = tpu.matmul %36, %16, %cst_8 {dimension_numbers = #tpu.dot_dimension_numbers<[1], [0], [0], [1], [0, 0, 1, 1], [], []>} : vector<16x64xbf16>, vector<64x32xbf16>, vector<16x32xf32> -> vector<16x32xf32>
    %39 = tpu.reciprocal %38 {approx = true} : vector<16x32xf32> -> vector<16x32xf32>
    %40 = arith.mulf %37, %39 : vector<16x32xf32>
    %41 = arith.truncf %40 : vector<16x32xf32> to vector<16x32xbf16>
    %cst_9 = arith.constant dense<0.000000e+00> : vector<16x32xf32>
    %42 = tpu.matmul %41, %6, %cst_9 {dimension_numbers = #tpu.dot_dimension_numbers<[1], [0], [0], [1], [0, 0, 1, 1], [], []>} : vector<16x32xbf16>, vector<32x32xbf16>, vector<16x32xf32> -> vector<16x32xf32>
    %43 = vector.broadcast %10 : vector<1x32xf32> to vector<16x32xf32>
    %44 = arith.addf %42, %43 : vector<16x32xf32>
    %45 = arith.addf %1, %44 : vector<16x32xf32>
    %cst_10 = arith.constant dense<0.000000e+00> : vector<16xf32>
    %46 = vector.multi_reduction <add>, %45, %cst_10 [1] : vector<16x32xf32> to vector<16xf32>
    %47 = vector.shape_cast %46 : vector<16xf32> to vector<16x1xf32>
    %cst_11 = arith.constant 3.200000e+01 : f32
    %48 = vector.broadcast %cst_11 : f32 to vector<16x1xf32>
    %49 = arith.divf %47, %48 : vector<16x1xf32>
    %50 = vector.broadcast %49 : vector<16x1xf32> to vector<16x32xf32>
    %51 = arith.subf %45, %50 : vector<16x32xf32>
    %52 = arith.mulf %51, %51 : vector<16x32xf32>
    %cst_12 = arith.constant dense<0.000000e+00> : vector<16xf32>
    %53 = vector.multi_reduction <add>, %52, %cst_12 [1] : vector<16x32xf32> to vector<16xf32>
    %54 = vector.shape_cast %53 : vector<16xf32> to vector<16x1xf32>
    %cst_13 = arith.constant 3.200000e+01 : f32
    %55 = vector.broadcast %cst_13 : f32 to vector<16x1xf32>
    %56 = arith.divf %54, %55 : vector<16x1xf32>
    %57 = vector.broadcast %49 : vector<16x1xf32> to vector<16x32xf32>
    %58 = arith.subf %45, %57 : vector<16x32xf32>
    %cst_14 = arith.constant 9.99999974E-6 : f32
    %59 = vector.broadcast %cst_14 : f32 to vector<16x1xf32>
    %60 = arith.addf %56, %59 : vector<16x1xf32>
    %61 = math.rsqrt %60 : vector<16x1xf32>
    %62 = vector.broadcast %61 : vector<16x1xf32> to vector<16x32xf32>
    %63 = arith.mulf %58, %62 : vector<16x32xf32>
    %64 = vector.broadcast %11 : vector<1x32xf32> to vector<16x32xf32>
    %65 = arith.mulf %63, %64 : vector<16x32xf32>
    %66 = vector.broadcast %12 : vector<1x32xf32> to vector<16x32xf32>
    %67 = arith.addf %65, %66 : vector<16x32xf32>
    %68 = arith.addf %67, %44 : vector<16x32xf32>
    %cst_15 = arith.constant dense<0.000000e+00> : vector<16xf32>
    %69 = vector.multi_reduction <add>, %68, %cst_15 [1] : vector<16x32xf32> to vector<16xf32>
    %70 = vector.shape_cast %69 : vector<16xf32> to vector<16x1xf32>
    %cst_16 = arith.constant 3.200000e+01 : f32
    %71 = vector.broadcast %cst_16 : f32 to vector<16x1xf32>
    %72 = arith.divf %70, %71 : vector<16x1xf32>
    %73 = vector.broadcast %72 : vector<16x1xf32> to vector<16x32xf32>
    %74 = arith.subf %68, %73 : vector<16x32xf32>
    %75 = arith.mulf %74, %74 : vector<16x32xf32>
    %cst_17 = arith.constant dense<0.000000e+00> : vector<16xf32>
    %76 = vector.multi_reduction <add>, %75, %cst_17 [1] : vector<16x32xf32> to vector<16xf32>
    %77 = vector.shape_cast %76 : vector<16xf32> to vector<16x1xf32>
    %cst_18 = arith.constant 3.200000e+01 : f32
    %78 = vector.broadcast %cst_18 : f32 to vector<16x1xf32>
    %79 = arith.divf %77, %78 : vector<16x1xf32>
    %80 = vector.broadcast %72 : vector<16x1xf32> to vector<16x32xf32>
    %81 = arith.subf %68, %80 : vector<16x32xf32>
    %cst_19 = arith.constant 9.99999974E-6 : f32
    %82 = vector.broadcast %cst_19 : f32 to vector<16x1xf32>
    %83 = arith.addf %79, %82 : vector<16x1xf32>
    %84 = math.rsqrt %83 : vector<16x1xf32>
    %85 = vector.broadcast %84 : vector<16x1xf32> to vector<16x32xf32>
    %86 = arith.mulf %81, %85 : vector<16x32xf32>
    %87 = vector.broadcast %13 : vector<1x32xf32> to vector<16x32xf32>
    %88 = arith.mulf %86, %87 : vector<16x32xf32>
    %89 = vector.broadcast %14 : vector<1x32xf32> to vector<16x32xf32>
    %90 = arith.addf %88, %89 : vector<16x32xf32>
    %c0_20 = arith.constant 0 : index
    %c0_21 = arith.constant 0 : index
    %91 = vector.load %arg3[%c0_20, %c0_21] : memref<16x32xf32, #tpu.memory_space<vmem>>, vector<16x32xf32>
    tpu.vector_store %arg3[%c0_20, %c0_21], %90 {strides = array<i32>} : memref<16x32xf32, #tpu.memory_space<vmem>>, vector<16x32xf32>,
    return
  }
}

</mosaic_0001>

<bundles_post_ra>
// kernel: tpu_custom_call.1
= control target key start
LH: loop header
LB: loop body
LE: loop exit
PB: predicated region body
PF: predicated region fallthrough
CT: control target
= control target key end

     0   :  { %v83_v3 = vlaneseq  ;;  %v584_v4 = vmov 0.0   ;;  %vm585_vm0 = vmmov 0   ;;  %s759_s0 = inlined_call_operand.vmem [shape: f32[16,96], index: 0, kind: input, shape index: {}]   ;;  %s760_s1 = inlined_call_operand.vmem [shape: f32[32,96], index: 1, kind: input, shape index: {}]   ;;  %s761_s2 = inlined_call_operand.vmem [shape: f32[72,32], index: 2, kind: input, shape index: {}]   ;;  %s762_s3 = inlined_call_operand.hbm [shape: f32[16,32], index: 3, kind: output, shape index: {}]  }
   0x1   :  { %v20_v0 = vld [vmem:[%s760_s1 + $0x10] sm:$0xff]  ;;  %v21_v1 = vld [vmem:[%s760_s1 + $0x18] sm:$0xff]  ;;  %v18_v2 = vld [vmem:[%s760_s1] sm:$0xff]  ;;  %486 = vmatprep.subr.bf16.mxu0 %v584_v4  ;;  %490 = vmatprep.mubr.msk.bf16.mxu0 %vm585_vm0, %v584_v4 }
   0x2   :  { %v622_v5 = vpack.c.bf16 %v21_v1, %v20_v0  ;;  %v19_v6 = vld [vmem:[%s760_s1 + $0x8] sm:$0xff]  ;;  %v632_v7 = vld [vmem:[%s759_s0] sm:$0xff]  ;;  %v634_v8 = vshrl.u32 %v83_v3, 7  ;;  %v30_v10 = vld [vmem:[%s761_s2 + $0x30] sm:$0xff]  ;;  %494 = vmatprep.subr.bf16.mxu1 %v584_v4  ;;  %502 = vmatprep.mubr.msk.bf16.mxu1 %vm585_vm0, %v584_v4 }
   0x3   :  { %v29_v9 = vld [vmem:[%s761_s2 + $0x28] sm:$0xff]  ;;  %v646_v11 = vpack.c.bf16 %v19_v6, %v18_v2  ;;  %v656_v13 = vld [vmem:[%s761_s2] sm:$0xff]  ;;  %v27_v15 = vld [vmem:[%s761_s2 + $0x18] sm:$0xff] }
   0x4   :  { %487 = vmatpush3.bf16.msra.mxu0 %v622_v5  ;;  %v651_v12 = vld [vmem:[%s759_s0 + $0x8] sm:$0xff]  ;;  %v658_v14 = vpack.c.bf16 %v30_v10, %v29_v9  ;;  %v91_v16 = vsub.s32 1, %v634_v8  ;;  %v28_v17 = vld [vmem:[%s761_s2 + $0x20] sm:$0xff]  ;;  %s586_s0 = smov 32   ;;  %v31_v18 = vld [vmem:[%s761_s2 + $0x38] sm:$0xff] }
   0x5   :  { %488 = vmatprep.subr.bf16.mxu0 %v584_v4  ;;  %v32_v19 = vld [vmem:[%s761_s2 + $0x40] sm:$0xff]  ;;  %v675_v20 = vpack.c.bf16 %v28_v17, %v27_v15 }
   0x6   :  { %108 = vrot.lane.b32.xlu1 %v658_v14, %s586_s0 }
   0x7   :  { %8 = vsyncpa [#allocation3], 0  ;;  %v37_v21 = vpack.c.bf16 %v651_v12, %v632_v7  ;;  %v92_v22 = vrot.slane %v656_v13, %v91_v16  ;;  %vm38_vm1 = vcmask 261120   ;;  %v681_v23 = vpack.c.bf16 %v32_v19, %v31_v18  ;;  %v25_v24 = vld [vmem:[%s761_s2 + $0x8] sm:$0xff]  ;;  %v26_v25 = vld [vmem:[%s761_s2 + $0x10] sm:$0xff]  ;;  %s587_s2 = smov 96  }
   0x8   :  { %489 = vmatpush3.bf16.msra.mxu0 %v646_v11  ;;  %v695_v26 = vpack.c.bf16 %v26_v25, %v25_v24  ;;  %v85_v27 = vsub.s32 0, %v634_v8  ;;  %vm197_vm2 = vcmask 523264   ;;  %s588_s14 = smov 64   ;;  %s589_s15 = smov [#allocation2]  }
   0x9   :  { %94 = vrot.lane.b32.xlu0 %v92_v22, %s586_s0  ;;  %506 = vmatprep.subr.bf16.mxu0 %v584_v4  ;;  %s449_s16 = sshll.u32 %s589_s15, 4  ;;  %s450_s16 = int_to_ptr.vmem [resolvable:$true] %s449_s16 }
   0xa   :  { %106 = vrot.lane.b32.xlu1 %v675_v20, %s586_s0  ;;  %v86_v30 = vrot.slane %v656_v13, %v85_v27  ;;  %s562_s17 = scalar_lea.vmem %s450_s16, 256  ;;  %p567_p1 = scmp.lt.s32.totalorder %s450_s16, %s450_s16 }
   0xb   :  { %491 = vmatmul.mubr.msk.bf16.vlgmr.msra.gmra.mxu0 %vm38_vm1, %v37_v21  ;;  %p563_p0 = scmp.ne.s32.totalorder %s450_s16, %s562_s17  ;;  %p568_p2 = scmp.lt.s32.totalorder %s562_s17, %s562_s17 }
   0xc   :  { %514 = vmatprep.mubr.msk.bf16.mxu0 %vm585_vm0, %v584_v4 }
   0xd   :  { %110 = vrot.lane.b32.xlu0 %v681_v23, %s586_s0  ;;  %p569_p3 = por %p568_p2, %p567_p1 }
   0xf   :  { %p570_p4 = pnand %p569_p3, %p563_p0 }
  0x11   :  { %104 = vrot.lane.b32.xlu0 %v695_v26, %s586_s0 }
  0x78   :  { %v109_v32 = vpop.permute.xlu1 %108 }
  0x7b   :  { %v95_v28 = vpop.permute.xlu0 %94 }
  0x7c   :  { %v107_v44 = vpop.permute.xlu1 %106 }
  0x7f   :  { %v111_v33 = vpop.permute.xlu0 %110 }
  0x83   :  { %v105_v45 = vpop.permute.xlu0 %104 }
  0xcb   :  { %v76_v29 = vpop.f32.mrf.mxu0 }
  0xcc   :  { %v87_v35 = vadd.f32 %v86_v30, %v76_v29  ;;  %v97_v36 = vadd.f32 %v95_v28, %v76_v29 }
  0xcd   :  { %v492_v31 = vpop.f32.mrf.mxu0 }
  0xcf   :  { %v79_v34 = vpop.f32.mrf.mxu0 }
  0xd0   :  { %v88_v37 = vadd.f32 %v86_v30, %v79_v34  ;;  %v98_v38 = vadd.f32 %v95_v28, %v79_v34 }
  0xd1   :  { %v493_v39 = vpop.f32.mrf.mxu0 }
  0xd2   :  { %v99_v40 = vpack.c.bf16 %v98_v38, %v97_v36  ;;  %v120_v41 = vpack.c.bf16 %v88_v37, %v87_v35 }
  0xd4   :  { %v119_v42 = vmul.bf16 %v111_v33, %v99_v40  ;;  %v118_v43 = vmul.bf16 %v109_v32, %v99_v40  ;;  %v117_v46 = vmul.bf16 %v107_v44, %v99_v40  ;;  %v116_v47 = vmul.bf16 %v105_v45, %v99_v40 }
  0xd6   :  { %131 = vrot.lane.b32.xlu1 %v119_v42, %s587_s2  ;;  %129 = vrot.lane.b32.xlu0 %v118_v43, %s587_s2 }
  0xda   :  { %127 = vrot.lane.b32.xlu1 %v117_v46, %s587_s2  ;;  %125 = vrot.lane.b32.xlu0 %v116_v47, %s587_s2 }
  0xde   :  { %135 = vrot.lane.b32.xlu1 %v632_v7, %s587_s2  ;;  %137 = vrot.lane.b32.xlu0 %v651_v12, %s587_s2 }
 0x148   :  { %v132_v48 = vpop.permute.xlu1 %131  ;;  %v130_v50 = vpop.permute.xlu0 %129 }
 0x149   :  { %507 = vmatpush3.bf16.msra.mxu0 %v132_v48  ;;  %v154_v49 = vsel %vm38_vm1, %v132_v48, 0  ;;  %v151_v52 = vsel %vm38_vm1, %v130_v50, 0 }
 0x14a   :  { %495 = vmatpush3.bf16.xpose.msra.mxu1 %v154_v49  ;;  %508 = vmatprep.subr.bf16.mxu0 %v584_v4 }
 0x14b   :  { %496 = vmatprep.subr.bf16.mxu1 %v584_v4 }
 0x14c   :  { %v128_v51 = vpop.permute.xlu1 %127  ;;  %v126_v53 = vpop.permute.xlu0 %125 }
 0x14d   :  { %509 = vmatpush3.bf16.msra.mxu0 %v130_v50  ;;  %v148_v54 = vsel %vm38_vm1, %v128_v51, 0  ;;  %v145_v55 = vsel %vm38_vm1, %v126_v53, 0 }
 0x14e   :  { %510 = vmatprep.subr.bf16.mxu0 %v584_v4 }
 0x150   :  { %v136_v56 = vpop.permute.xlu1 %135  ;;  %v138_v60 = vpop.permute.xlu0 %137 }
 0x151   :  { %511 = vmatpush3.bf16.msra.mxu0 %v128_v51 }
 0x152   :  { %497 = vmatpush3.bf16.xpose.msra.mxu1 %v151_v52  ;;  %512 = vmatprep.subr.bf16.mxu0 %v584_v4 }
 0x153   :  { %498 = vmatprep.subr.bf16.mxu1 %v584_v4 }
 0x155   :  { %513 = vmatpush3.bf16.msra.mxu0 %v126_v53 }
 0x156   :  { %518 = vmatprep.subr.bf16.mxu0 %v584_v4 }
 0x15a   :  { %499 = vmatpush3.bf16.xpose.msra.mxu1 %v148_v54 }
 0x15b   :  { %500 = vmatprep.subr.bf16.mxu1 %v584_v4 }
 0x162   :  { %501 = vmatpush3.bf16.xpose.msra.mxu1 %v145_v55 }
 0x163   :  { %530 = vmatprep.subr.bf16.mxu1 %v584_v4 }
 0x169   :  { %503 = vmatmul.mubr.msk.bf16.vlgmr.msra.gmra.mxu1 %vm38_vm1, %v120_v41 }
 0x16a   :  { %534 = vmatprep.mubr.msk.bf16.mxu1 %vm585_vm0, %v584_v4 }
 0x229   :  { %v190_v57 = vpop.f32.mrf.mxu1 }
 0x22a   :  { %v191_v58 = vadd.f32 %v190_v57, %v136_v56  ;;  %v392_v56 = vsub.s32 3, %v634_v8  ;;  %v398_v57 = vsub.s32 4, %v634_v8 }
 0x22b   :  { %v504_v59 = vpop.f32.mrf.mxu1 }
 0x22c   :  { %v198_v61 = vsel %vm197_vm2, %v191_v58, -inf }
 0x22d   :  { %199 = vmax.xlane.f32.xlu1 %v198_v61  ;;  %v193_v62 = vpop.f32.mrf.mxu1  ;;  %v399_v61 = vrot.slane %v656_v13, %v398_v57 }
 0x22e   :  { %v194_v63 = vadd.f32 %v193_v62, %v138_v60 }
 0x22f   :  { %v505_v0 = vpop.f32.mrf.mxu1 }
 0x230   :  { %v201_v1 = vsel %vm197_vm2, %v194_v63, -inf }
 0x231   :  { %202 = vmax.xlane.f32.xlu0 %v201_v1 }
 0x23e   :  { %311 = vrot.lane.b32.xlu1 %v646_v11, %s588_s14 }
 0x247   :  { %313 = vrot.lane.b32.xlu0 %v622_v5, %s588_s14 }
 0x2b6   :  { %v200_v2 = vpop.xlane.xlu1 %199 }
 0x2b7   :  { %v204_v3 = vsub.f32 %v191_v58, %v200_v2  ;;  %v393_v58 = vrot.slane %v656_v13, %v392_v56 }
 0x2b9   :  { %v206_v6 = vmul.f32 1.442695, %v204_v3 }
 0x2ba   :  { %v203_v9 = vpop.xlane.xlu0 %202  ;;  %v312_v11 = vpop.permute.xlu1 %311 }
 0x2bb   :  { %v205_v10 = vsub.f32 %v194_v63, %v203_v9  ;;  %546 = vpow2.f32 %v206_v6 }
 0x2bd   :  { %v208_v15 = vmul.f32 1.442695, %v205_v10 }
 0x2be   :  { %v314_v5 = vpop.permute.xlu0 %313 }
 0x2bf   :  { %548 = vpow2.f32 %v208_v15  ;;  %531 = vmatpush3.bf16.msra.mxu1 %v314_v5 }
 0x2c0   :  { %532 = vmatprep.subr.bf16.mxu1 %v584_v4 }
 0x2c3   :  { %533 = vmatpush3.bf16.msra.mxu1 %v312_v11 }
 0x2c8   :  { %v547_v16 = vpop.eup %546 }
 0x2cc   :  { %v549_v17 = vpop.eup %548 }
 0x2cd   :  { %v210_v18 = vpack.c.bf16 %v549_v17, %v547_v16 }
 0x2cf   :  { %515 = vmatmul.mubr.msk.bf16.vlgmr.msra.gmra.mxu0 %vm197_vm2, %v210_v18 }
 0x2d0   :  { %519 = vmatpush3.bf16.msra.mxu0 %v681_v23  ;;  %526 = vmatprep.mubr.msk.bf16.mxu0 %vm585_vm0, %v584_v4 }
 0x2d1   :  { %520 = vmatprep.subr.bf16.mxu0 %v584_v4 }
 0x2d4   :  { %521 = vmatpush3.bf16.msra.mxu0 %v658_v14 }
 0x2d5   :  { %522 = vmatprep.subr.bf16.mxu0 %v584_v4 }
 0x2d8   :  { %523 = vmatpush3.bf16.msra.mxu0 %v675_v20 }
 0x2d9   :  { %524 = vmatprep.subr.bf16.mxu0 %v584_v4  ;;  %v307_v4 = vsub.s32 2, %v634_v8 }
 0x2db   :  { %v308_v31 = vrot.slane %v656_v13, %v307_v4 }
 0x2dc   :  { %525 = vmatpush3.bf16.msra.mxu0 %v695_v26 }
 0x2df   :  { %527 = vmatmul.mubr.msk.bf16.vlgmr.msra.gmra.mxu0 %vm197_vm2, %v210_v18 }
 0x38f   :  { %v252_v19 = vpop.f32.mrf.mxu0 }
 0x391   :  { %v516_v21 = vpop.f32.mrf.mxu0 }
 0x393   :  { %v255_v22 = vpop.f32.mrf.mxu0 }
 0x395   :  { %v517_v14 = vpop.f32.mrf.mxu0 }
 0x39f   :  { %v293_v23 = vpop.f32.mrf.mxu0 }
 0x3a0   :  { %550 = vrcp.f32 %v293_v23 }
 0x3a1   :  { %v528_v24 = vpop.f32.mrf.mxu0 }
 0x3a3   :  { %v296_v20 = vpop.f32.mrf.mxu0 }
 0x3a4   :  { %552 = vrcp.f32 %v296_v20 }
 0x3a5   :  { %v529_v25 = vpop.f32.mrf.mxu0 }
 0x3ad   :  { %v551_v27 = vpop.eup %550 }
 0x3ae   :  { %v302_v28 = vmul.f32 %v551_v27, %v252_v19 }
 0x3b1   :  { %v553_v26 = vpop.eup %552 }
 0x3b2   :  { %v303_v29 = vmul.f32 %v553_v26, %v255_v22 }
 0x3b4   :  { %v304_v30 = vpack.c.bf16 %v303_v29, %v302_v28  ;;  %v432_v29 = vsub.s32 5, %v634_v8 }
 0x3b6   :  { %535 = vmatmul.mubr.msk.bf16.vlgmr.msra.gmra.mxu1 %vm38_vm1, %v304_v30  ;;  %v438_v30 = vsub.s32 6, %v634_v8  ;;  %v433_v4 = vrot.slane %v656_v13, %v432_v29 }
 0x476   :  { %v354_v32 = vpop.f32.mrf.mxu1 }
 0x477   :  { %v355_v33 = vadd.f32 %v354_v32, %v308_v31 }
 0x478   :  { %v536_v34 = vpop.f32.mrf.mxu1 }
 0x479   :  { %v361_v35 = vadd.f32 %v355_v33, %v632_v7 }
 0x47a   :  { %v357_v36 = vpop.f32.mrf.mxu1 }
 0x47b   :  { %v358_v37 = vadd.f32 %v357_v36, %v308_v31  ;;  %v363_v38 = vsel %vm38_vm1, %v361_v35, 0.0 }
 0x47c   :  { %364 = vadd.xlane.f32.xlu1 %v363_v38  ;;  %v537_v39 = vpop.f32.mrf.mxu1 }
 0x47d   :  { %v362_v40 = vadd.f32 %v358_v37, %v651_v12 }
 0x47f   :  { %v366_v41 = vsel %vm38_vm1, %v362_v40, 0.0 }
 0x480   :  { %367 = vadd.xlane.f32.xlu0 %v366_v41 }
 0x505   :  { %v365_v42 = vpop.xlane.xlu1 %364 }
 0x506   :  { %v370_v43 = vmul.f32 0.03125, %v365_v42 }
 0x508   :  { %v372_v44 = vsub.f32 %v361_v35, %v370_v43 }
 0x509   :  { %v368_v45 = vpop.xlane.xlu0 %367 }
 0x50a   :  { %v371_v46 = vmul.f32 0.03125, %v368_v45  ;;  %v374_v47 = vmul.f32 %v372_v44, %v372_v44 }
 0x50c   :  { %v373_v48 = vsub.f32 %v362_v40, %v371_v46  ;;  %v376_v7 = vsel %vm38_vm1, %v374_v47, 0.0 }
 0x50d   :  { %377 = vadd.xlane.f32.xlu0 %v376_v7 }
 0x50e   :  { %v375_v49 = vmul.f32 %v373_v48, %v373_v48 }
 0x510   :  { %v379_v50 = vsel %vm38_vm1, %v375_v49, 0.0 }
 0x511   :  { %380 = vadd.xlane.f32.xlu1 %v379_v50 }
 0x596   :  { %v378_v51 = vpop.xlane.xlu0 %377 }
 0x597   :  { %v382_v52 = vmul.f32 0.03125, %v378_v51 }
 0x599   :  { %v384_v12 = vadd.f32 1e-05, %v382_v52 }
 0x59a   :  { %v381_v53 = vpop.xlane.xlu1 %380 }
 0x59b   :  { %554 = vrsqrt.f32 %v384_v12  ;;  %v383_v54 = vmul.f32 0.03125, %v381_v53 }
 0x59d   :  { %v385_v55 = vadd.f32 1e-05, %v383_v54 }
 0x59f   :  { %556 = vrsqrt.f32 %v385_v55 }
 0x5a8   :  { %v555_v59 = vpop.eup %554 }
 0x5a9   :  { %v388_v60 = vmul.f32 %v555_v59, %v372_v44 }
 0x5ab   :  { %v394_v62 = vmul.f32 %v393_v58, %v388_v60 }
 0x5ac   :  { %v557_v63 = vpop.eup %556 }
 0x5ad   :  { %v400_v0 = vadd.f32 %v399_v61, %v394_v62  ;;  %v389_v1 = vmul.f32 %v557_v63, %v373_v48 }
 0x5af   :  { %v402_v2 = vadd.f32 %v400_v0, %v355_v33  ;;  %v395_v3 = vmul.f32 %v393_v58, %v389_v1  ;;  %v439_v33 = vrot.slane %v656_v13, %v438_v30 }
 0x5b1   :  { %v404_v6 = vsel %vm38_vm1, %v402_v2, 0.0  ;;  %v401_v9 = vadd.f32 %v399_v61, %v395_v3 }
 0x5b2   :  { %405 = vadd.xlane.f32.xlu0 %v404_v6 }
 0x5b3   :  { %v403_v10 = vadd.f32 %v401_v9, %v358_v37 }
 0x5b5   :  { %v407_v15 = vsel %vm38_vm1, %v403_v10, 0.0 }
 0x5b6   :  { %408 = vadd.xlane.f32.xlu1 %v407_v15 }
 0x63b   :  { %v406_v16 = vpop.xlane.xlu0 %405 }
 0x63c   :  { %v410_v17 = vmul.f32 0.03125, %v406_v16 }
 0x63e   :  { %v412_v18 = vsub.f32 %v402_v2, %v410_v17 }
 0x63f   :  { %v409_v5 = vpop.xlane.xlu1 %408 }
 0x640   :  { %v411_v11 = vmul.f32 0.03125, %v409_v5  ;;  %v414_v19 = vmul.f32 %v412_v18, %v412_v18 }
 0x642   :  { %v413_v21 = vsub.f32 %v403_v10, %v411_v11  ;;  %v416_v22 = vsel %vm38_vm1, %v414_v19, 0.0 }
 0x643   :  { %417 = vadd.xlane.f32.xlu0 %v416_v22 }
 0x644   :  { %v415_v14 = vmul.f32 %v413_v21, %v413_v21 }
 0x646   :  { %v419_v23 = vsel %vm38_vm1, %v415_v14, 0.0 }
 0x647   :  { %420 = vadd.xlane.f32.xlu1 %v419_v23 }
 0x6cc   :  { %v418_v24 = vpop.xlane.xlu0 %417 }
 0x6cd   :  { %v422_v20 = vmul.f32 0.03125, %v418_v24 }
 0x6cf   :  { %v424_v25 = vadd.f32 1e-05, %v422_v20 }
 0x6d0   :  { %v421_v27 = vpop.xlane.xlu1 %420 }
 0x6d1   :  { %558 = vrsqrt.f32 %v424_v25  ;;  %v423_v26 = vmul.f32 0.03125, %v421_v27 }
 0x6d3   :  { %v425_v28 = vadd.f32 1e-05, %v423_v26 }
 0x6d5   :  { %560 = vrsqrt.f32 %v425_v28 }
 0x6de   :  { %v559_v31 = vpop.eup %558 }
 0x6df   :  { %v428_v32 = vmul.f32 %v559_v31, %v412_v18 }
 0x6e1   :  { %v434_v34 = vmul.f32 %v433_v4, %v428_v32 }
 0x6e2   :  { %v561_v35 = vpop.eup %560 }
 0x6e3   :  { %v429_v36 = vmul.f32 %v561_v35, %v413_v21  ;;  %v440_v37 = vadd.f32 %v439_v33, %v434_v34 }
 0x6e5   :  { %v435_v38 = vmul.f32 %v433_v4, %v429_v36  ;;  %442 = vst.msk [vmem:[#allocation2] sm:$0xff] %vm38_vm1, %v440_v37 }
 0x6e7   :  { %v441_v39 = vadd.f32 %v439_v33, %v435_v38 }
 0x6e9   :  { %443 = vst.msk [vmem:[#allocation2 + $0x8] sm:$0xff] %vm38_vm1, %v441_v39 }
 0x6ea   :  { %573 = shalt.err (!%p570_p4)
}
 0x6eb   :  { %s590_s18 = smov 128   ;;  %s591_s19 = smov 8  }
 0x6ec   :  { %455 = dma.vmem_to_hbm [thread:$0]  %s450_s16, 256, %s762_s3, [#allocation3], %s590_s18, %s590_s18, %s591_s19  }
 0x6ed   :  { %582 = dma.done.wait [#allocation3], 256  }
 0x6ee   :  { %583 = vsyncadd [#allocation3], 4294967040 }
 0x6ef   :  { %459 = vsyncpa [#allocation3], 1 }

</bundles_post_ra>
